<compile_context>
chip_gen: v5e
topology: v5e:2x2
jax: 0.10.0
libtpu: 0.0.40
codegen_flags: <defaults>
</compile_context>

<pallas_src>
import functools

import jax
import jax.numpy as jnp
from jax.experimental import pallas as pl
from jax.experimental.pallas import tpu as pltpu

NEG_SLOPE = 0.01  # F.leaky_relu default
LANE = 128
SUBLANE = 8


def _round_up(n, m):
    return ((n + m - 1) // m) * m


def _leaky_relu(x):
    return jnp.where(x > 0, x, NEG_SLOPE * x)


def mlp_kernel(x_ref, w1_ref, b1_ref, w2_ref, b2_ref, w8_ref, b8_ref, o_ref):
    # Weights are already [in, out]: no transposes inside the kernel.
    x = x_ref[...]
    h = jnp.dot(x, w1_ref[...], preferred_element_type=jnp.float32) + b1_ref[...]
    h = _leaky_relu(h)
    h = jnp.dot(h, w2_ref[...], preferred_element_type=jnp.float32) + b2_ref[...]
    h = _leaky_relu(h)
    o = jnp.dot(h, w8_ref[...], preferred_element_type=jnp.float32) + b8_ref[...]
    o_ref[...] = o.astype(o_ref.dtype)


@functools.partial(jax.jit, static_argnames=("block_b", "compute_dtype"))
def net_forward(x, params, *, block_b=256, compute_dtype=jnp.float32):
    """Pallas forward pass of Net(inputSize, hiddenSize, outputSize).

    params follow PyTorch nn.Linear convention: W[out, in], b broadcastable to (out,).
    """
    w1, b1, w2, b2, w8, b8 = params
    B, I = x.shape
    H = w1.shape[0]
    O = w8.shape[0]

    # Lane/sublane padding targets (128 is enough for v5e's 4x128^2 MXU and
    # aligned for v6e/v7x; don't over-pad to 256).
    I_p = _round_up(I, LANE)
    H_p = _round_up(H, LANE)
    O_p = _round_up(O, LANE)

    # Batch tiling: stream batch tiles through the pipeline, weights stay resident.
    if B <= block_b:
        TB = _round_up(B, SUBLANE)
        B_p = TB
    else:
        TB = block_b
        B_p = _round_up(B, TB)
    # TODO(synk): for very large hidden_size on v7x (64 MiB VMEM), add a K-tiling
    # grid axis ("arbitrary") over hidden instead of keeping W2 fully resident.

    # One-time wrapper-side layout plumbing: transpose to [in, out] and zero-pad.
    def prep_w(w, in_p, out_p):
        wt = jnp.asarray(w, compute_dtype).T  # [in, out]
        return jnp.pad(wt, ((0, in_p - wt.shape[0]), (0, out_p - wt.shape[1])))

    def prep_b(b, out_p):
        b2d = jnp.asarray(b, compute_dtype).reshape(1, -1)
        return jnp.pad(b2d, ((0, 0), (0, out_p - b2d.shape[1])))

    w1p, b1p = prep_w(w1, I_p, H_p), prep_b(b1, H_p)
    w2p, b2p = prep_w(w2, H_p, H_p), prep_b(b2, H_p)
    w8p, b8p = prep_w(w8, H_p, O_p), prep_b(b8, O_p)
    xp = jnp.pad(jnp.asarray(x, compute_dtype), ((0, B_p - B), (0, I_p - I)))

    vmem = pltpu.MemorySpace.VMEM

    def resident(shape):
        # Same block index for every grid step -> fetched once, stays in VMEM.
        return pl.BlockSpec(shape, lambda i: (0, 0), memory_space=vmem)

    out_padded = pl.pallas_call(
        mlp_kernel,
        out_shape=jax.ShapeDtypeStruct((B_p, O_p), jnp.float32),
        grid_spec=pltpu.PrefetchScalarGridSpec(
            num_scalar_prefetch=0,
            grid=(B_p // TB,),
            in_specs=[
                pl.BlockSpec((TB, I_p), lambda i: (i, 0), memory_space=vmem),
                resident((I_p, H_p)), resident((1, H_p)),
                resident((H_p, H_p)), resident((1, H_p)),
                resident((H_p, O_p)), resident((1, O_p)),
            ],
            out_specs=pl.BlockSpec((TB, O_p), lambda i: (i, 0), memory_space=vmem),
        ),
        compiler_params=pltpu.CompilerParams(
            dimension_semantics=("parallel",),  # batch tiles shard across TCs on v7x
        ),
    )(xp, w1p, b1p, w2p, b2p, w8p, b8p)

    return out_padded[:B, :O]


def init_params(key, input_size, hidden_size, output_size):
    """Deterministic init mimicking nn.Linear shapes (W: [out, in], b: [1, out])."""
    ks = jax.random.split(key, 6)

    def lin(kw, kb, fan_in, fan_out):
        bound = 1.0 / jnp.sqrt(fan_in)
        w = jax.random.uniform(kw, (fan_out, fan_in), jnp.float32, -bound, bound)
        b = jax.random.uniform(kb, (1, fan_out), jnp.float32, -bound, bound)
        return w, b

    w1, b1 = lin(ks[0], ks[1], input_size, hidden_size)
    w2, b2 = lin(ks[2], ks[3], hidden_size, hidden_size)
    w8, b8 = lin(ks[4], ks[5], hidden_size, output_size)
    return (w1, b1, w2, b2, w8, b8)


def reference_forward(x, params):
    w1, b1, w2, b2, w8, b8 = params
    h = jax.nn.leaky_relu(x @ w1.T + b1, NEG_SLOPE)
    h = jax.nn.leaky_relu(h @ w2.T + b2, NEG_SLOPE)
    return h @ w8.T + b8


if __name__ == "__main__":
    input_size, hidden_size, output_size = 16, 32, 8
    batch = 4

    key = jax.random.PRNGKey(0)
    k_x, k_p = jax.random.split(key)
    x = jax.random.normal(k_x, (batch, input_size), jnp.float32)
    params = init_params(k_p, input_size, hidden_size, output_size)

    out = net_forward(x, params)
    jax.block_until_ready(out)

    ref = reference_forward(x, params)
    assert out.shape == (batch, output_size)
    assert jnp.allclose(out, ref, atol=1e-5, rtol=1e-5), float(
        jnp.max(jnp.abs(out - ref))
    )

    print("KERNEL_OK")
</pallas_src>

<mosaic_0001>
module attributes {stable_mosaic.version = 11 : i64} {
  func.func @mlp_kernel(%arg0: i32, %arg1: memref<8x128xf32, #tpu.memory_space<vmem>>, %arg2: memref<128x128xf32, #tpu.memory_space<vmem>>, %arg3: memref<1x128xf32, #tpu.memory_space<vmem>>, %arg4: memref<128x128xf32, #tpu.memory_space<vmem>>, %arg5: memref<1x128xf32, #tpu.memory_space<vmem>>, %arg6: memref<128x128xf32, #tpu.memory_space<vmem>>, %arg7: memref<1x128xf32, #tpu.memory_space<vmem>>, %arg8: memref<8x128xf32, #tpu.memory_space<vmem>>) attributes {dimension_semantics = [#tpu.dimension_semantics<parallel>], iteration_bounds = array<i64: 1>, scalar_prefetch = 0 : i64, scratch_operands = 0 : i64, tpu.core_type = #tpu.core_type<tc>, window_params = [{transform_indices = @transform_0, window_bounds = array<i64: 8, 128>}, {pipeline_mode = #tpu.pipeline_mode<synchronous>, transform_indices = @transform_1, window_bounds = array<i64: 128, 128>}, {pipeline_mode = #tpu.pipeline_mode<synchronous>, transform_indices = @transform_2, window_bounds = array<i64: 1, 128>}, {pipeline_mode = #tpu.pipeline_mode<synchronous>, transform_indices = @transform_3, window_bounds = array<i64: 128, 128>}, {pipeline_mode = #tpu.pipeline_mode<synchronous>, transform_indices = @transform_4, window_bounds = array<i64: 1, 128>}, {pipeline_mode = #tpu.pipeline_mode<synchronous>, transform_indices = @transform_5, window_bounds = array<i64: 128, 128>}, {pipeline_mode = #tpu.pipeline_mode<synchronous>, transform_indices = @transform_6, window_bounds = array<i64: 1, 128>}, {transform_indices = @transform_7, window_bounds = array<i64: 8, 128>}]} {
    %c0 = arith.constant 0 : index
    %c0_0 = arith.constant 0 : index
    %0 = vector.load %arg1[%c0, %c0_0] : memref<8x128xf32, #tpu.memory_space<vmem>>, vector<8x128xf32>
    %c0_1 = arith.constant 0 : index
    %c0_2 = arith.constant 0 : index
    %1 = vector.load %arg2[%c0_1, %c0_2] : memref<128x128xf32, #tpu.memory_space<vmem>>, vector<128x128xf32>
    %cst = arith.constant dense<0.000000e+00> : vector<8x128xf32>
    %2 = tpu.matmul %0, %1, %cst {dimension_numbers = #tpu.dot_dimension_numbers<[1], [0], [0], [1], [0, 0, 1, 1], [], []>} : vector<8x128xf32>, vector<128x128xf32>, vector<8x128xf32> -> vector<8x128xf32>
    %c0_3 = arith.constant 0 : index
    %c0_4 = arith.constant 0 : index
    %3 = vector.load %arg3[%c0_3, %c0_4] : memref<1x128xf32, #tpu.memory_space<vmem>>, vector<1x128xf32>
    %4 = vector.broadcast %3 : vector<1x128xf32> to vector<8x128xf32>
    %5 = arith.addf %2, %4 : vector<8x128xf32>
    %cst_5 = arith.constant 0.000000e+00 : f32
    %6 = vector.broadcast %cst_5 : f32 to vector<8x128xf32>
    %7 = arith.cmpf ogt, %5, %6 : vector<8x128xf32>
    %cst_6 = arith.constant 0.00999999977 : f32
    %8 = vector.broadcast %cst_6 : f32 to vector<8x128xf32>
    %9 = arith.mulf %8, %5 : vector<8x128xf32>
    %10 = arith.select %7, %5, %9 : vector<8x128xi1>, vector<8x128xf32>
    %c0_7 = arith.constant 0 : index
    %c0_8 = arith.constant 0 : index
    %11 = vector.load %arg4[%c0_7, %c0_8] : memref<128x128xf32, #tpu.memory_space<vmem>>, vector<128x128xf32>
    %cst_9 = arith.constant dense<0.000000e+00> : vector<8x128xf32>
    %12 = tpu.matmul %10, %11, %cst_9 {dimension_numbers = #tpu.dot_dimension_numbers<[1], [0], [0], [1], [0, 0, 1, 1], [], []>} : vector<8x128xf32>, vector<128x128xf32>, vector<8x128xf32> -> vector<8x128xf32>
    %c0_10 = arith.constant 0 : index
    %c0_11 = arith.constant 0 : index
    %13 = vector.load %arg5[%c0_10, %c0_11] : memref<1x128xf32, #tpu.memory_space<vmem>>, vector<1x128xf32>
    %14 = vector.broadcast %13 : vector<1x128xf32> to vector<8x128xf32>
    %15 = arith.addf %12, %14 : vector<8x128xf32>
    %cst_12 = arith.constant 0.000000e+00 : f32
    %16 = vector.broadcast %cst_12 : f32 to vector<8x128xf32>
    %17 = arith.cmpf ogt, %15, %16 : vector<8x128xf32>
    %cst_13 = arith.constant 0.00999999977 : f32
    %18 = vector.broadcast %cst_13 : f32 to vector<8x128xf32>
    %19 = arith.mulf %18, %15 : vector<8x128xf32>
    %20 = arith.select %17, %15, %19 : vector<8x128xi1>, vector<8x128xf32>
    %c0_14 = arith.constant 0 : index
    %c0_15 = arith.constant 0 : index
    %21 = vector.load %arg6[%c0_14, %c0_15] : memref<128x128xf32, #tpu.memory_space<vmem>>, vector<128x128xf32>
    %cst_16 = arith.constant dense<0.000000e+00> : vector<8x128xf32>
    %22 = tpu.matmul %20, %21, %cst_16 {dimension_numbers = #tpu.dot_dimension_numbers<[1], [0], [0], [1], [0, 0, 1, 1], [], []>} : vector<8x128xf32>, vector<128x128xf32>, vector<8x128xf32> -> vector<8x128xf32>
    %c0_17 = arith.constant 0 : index
    %c0_18 = arith.constant 0 : index
    %23 = vector.load %arg7[%c0_17, %c0_18] : memref<1x128xf32, #tpu.memory_space<vmem>>, vector<1x128xf32>
    %24 = vector.broadcast %23 : vector<1x128xf32> to vector<8x128xf32>
    %25 = arith.addf %22, %24 : vector<8x128xf32>
    %c0_19 = arith.constant 0 : index
    %c0_20 = arith.constant 0 : index
    %26 = vector.load %arg8[%c0_19, %c0_20] : memref<8x128xf32, #tpu.memory_space<vmem>>, vector<8x128xf32>
    tpu.vector_store %arg8[%c0_19, %c0_20], %25 {strides = array<i32>} : memref<8x128xf32, #tpu.memory_space<vmem>>, vector<8x128xf32>,
    return
  }
  func.func @transform_0(%arg0: i32) -> (i32, i32) {
    %c0_i32 = arith.constant 0 : i32
    %c0_i32_0 = arith.constant 0 : i32
    return %arg0, %c0_i32 : i32, i32
  }
  func.func @transform_1(%arg0: i32) -> (i32, i32) {
    %c0_i32 = arith.constant 0 : i32
    %c0_i32_0 = arith.constant 0 : i32
    %c0_i32_1 = arith.constant 0 : i32
    return %c0_i32, %c0_i32_0 : i32, i32
  }
  func.func @transform_2(%arg0: i32) -> (i32, i32) {
    %c0_i32 = arith.constant 0 : i32
    %c0_i32_0 = arith.constant 0 : i32
    %c0_i32_1 = arith.constant 0 : i32
    return %c0_i32, %c0_i32_0 : i32, i32
  }
  func.func @transform_3(%arg0: i32) -> (i32, i32) {
    %c0_i32 = arith.constant 0 : i32
    %c0_i32_0 = arith.constant 0 : i32
    %c0_i32_1 = arith.constant 0 : i32
    return %c0_i32, %c0_i32_0 : i32, i32
  }
  func.func @transform_4(%arg0: i32) -> (i32, i32) {
    %c0_i32 = arith.constant 0 : i32
    %c0_i32_0 = arith.constant 0 : i32
    %c0_i32_1 = arith.constant 0 : i32
    return %c0_i32, %c0_i32_0 : i32, i32
  }
  func.func @transform_5(%arg0: i32) -> (i32, i32) {
    %c0_i32 = arith.constant 0 : i32
    %c0_i32_0 = arith.constant 0 : i32
    %c0_i32_1 = arith.constant 0 : i32
    return %c0_i32, %c0_i32_0 : i32, i32
  }
  func.func @transform_6(%arg0: i32) -> (i32, i32) {
    %c0_i32 = arith.constant 0 : i32
    %c0_i32_0 = arith.constant 0 : i32
    %c0_i32_1 = arith.constant 0 : i32
    return %c0_i32, %c0_i32_0 : i32, i32
  }
  func.func @transform_7(%arg0: i32) -> (i32, i32) {
    %c0_i32 = arith.constant 0 : i32
    %c0_i32_0 = arith.constant 0 : i32
    return %arg0, %c0_i32 : i32, i32
  }
}

</mosaic_0001>

<bundles_post_ra>
// kernel: net_forward.1
= control target key start
LH: loop header
LB: loop body
LE: loop exit
PB: predicated region body
PF: predicated region fallthrough
CT: control target
= control target key end

     0   :  { %s360_s1 = inlined_call_operand.vmem [shape: f32[128,128], index: 1, kind: input, shape index: {}]   ;;  %s361_s3 = inlined_call_operand.vmem [shape: f32[128,128], index: 3, kind: input, shape index: {}]   ;;  %s362_s2 = inlined_call_operand.vmem [shape: f32[1,128], index: 2, kind: input, shape index: {}]   ;;  %s363_s0 = inlined_call_operand.vmem [shape: f32[8,128], index: 0, kind: input, shape index: {}]   ;;  %s364_s4 = inlined_call_operand.vmem [shape: f32[1,128], index: 4, kind: input, shape index: {}]   ;;  %s365_s5 = inlined_call_operand.vmem [shape: f32[128,128], index: 5, kind: input, shape index: {}]   ;;  %s366_s6 = inlined_call_operand.vmem [shape: f32[1,128], index: 6, kind: input, shape index: {}]   ;;  %s367_s7 = inlined_call_operand.vmem [shape: f32[8,128], index: 7, kind: output, shape index: {}]  }
   0x1   :  { %v42_v0 = vld [vmem:[%s360_s1 + $0x78] sm:$0xff]  ;;  %v41_v1 = vld [vmem:[%s360_s1 + $0x70] sm:$0xff]  ;;  %v40_v2 = vld [vmem:[%s360_s1 + $0x68] sm:$0xff] }
   0x2   :  { %47 = vmatpush.msra.mxu0 %v42_v0  ;;  %v39_v3 = vld [vmem:[%s360_s1 + $0x60] sm:$0xff]  ;;  %v85_v4 = vld [vmem:[%s361_s3 + $0x78] sm:$0xff]  ;;  %v84_v6 = vld [vmem:[%s361_s3 + $0x70] sm:$0xff] }
   0x3   :  { %v38_v5 = vld [vmem:[%s360_s1 + $0x58] sm:$0xff]  ;;  %90 = vmatpush.msra.mxu1 %v85_v4  ;;  %v83_v7 = vld [vmem:[%s361_s3 + $0x68] sm:$0xff]  ;;  %v37_v8 = vld [vmem:[%s360_s1 + $0x50] sm:$0xff] }
   0x4   :  { %48 = vmatpush.msra.mxu0 %v41_v1  ;;  %v82_v9 = vld [vmem:[%s361_s3 + $0x60] sm:$0xff]  ;;  %v36_v10 = vld [vmem:[%s360_s1 + $0x48] sm:$0xff]  ;;  %v81_v11 = vld [vmem:[%s361_s3 + $0x58] sm:$0xff] }
   0x5   :  { %91 = vmatpush.msra.mxu1 %v84_v6  ;;  %v35_v12 = vld [vmem:[%s360_s1 + $0x40] sm:$0xff]  ;;  %v80_v13 = vld [vmem:[%s361_s3 + $0x50] sm:$0xff]  ;;  %v34_v14 = vld [vmem:[%s360_s1 + $0x38] sm:$0xff] }
   0x6   :  { %49 = vmatpush.msra.mxu0 %v40_v2  ;;  %v79_v15 = vld [vmem:[%s361_s3 + $0x48] sm:$0xff]  ;;  %v33_v16 = vld [vmem:[%s360_s1 + $0x30] sm:$0xff]  ;;  %v78_v17 = vld [vmem:[%s361_s3 + $0x40] sm:$0xff] }
   0x7   :  { %92 = vmatpush.msra.mxu1 %v83_v7  ;;  %v32_v18 = vld [vmem:[%s360_s1 + $0x28] sm:$0xff]  ;;  %v77_v19 = vld [vmem:[%s361_s3 + $0x38] sm:$0xff]  ;;  %v31_v20 = vld [vmem:[%s360_s1 + $0x20] sm:$0xff] }
   0x8   :  { %50 = vmatpush.msra.mxu0 %v39_v3  ;;  %v76_v21 = vld [vmem:[%s361_s3 + $0x30] sm:$0xff]  ;;  %v30_v22 = vld [vmem:[%s360_s1 + $0x18] sm:$0xff]  ;;  %v75_v23 = vld [vmem:[%s361_s3 + $0x28] sm:$0xff] }
   0x9   :  { %93 = vmatpush.msra.mxu1 %v82_v9  ;;  %v29_v24 = vld [vmem:[%s360_s1 + $0x10] sm:$0xff]  ;;  %v74_v25 = vld [vmem:[%s361_s3 + $0x20] sm:$0xff]  ;;  %v28_v26 = vld [vmem:[%s360_s1 + $0x8] sm:$0xff] }
   0xa   :  { %51 = vmatpush.msra.mxu0 %v38_v5  ;;  %v73_v27 = vld [vmem:[%s361_s3 + $0x18] sm:$0xff]  ;;  %v27_v28 = vld [vmem:[%s360_s1] sm:$0xff]  ;;  %v72_v30 = vld [vmem:[%s361_s3 + $0x10] sm:$0xff] }
   0xb   :  { %94 = vmatpush.msra.mxu1 %v81_v11  ;;  %v26_v29 = vld [vmem:[%s363_s0] sm:$0xff]  ;;  %v71_v31 = vld [vmem:[%s361_s3 + $0x8] sm:$0xff]  ;;  %v128_v33 = vld [vmem:[%s365_s5 + $0x78] sm:$0xff] }
   0xc   :  { %52 = vmatpush.msra.mxu0 %v37_v8  ;;  %v70_v32 = vld [vmem:[%s361_s3] sm:$0xff]  ;;  %v127_v34 = vld [vmem:[%s365_s5 + $0x70] sm:$0xff]  ;;  %133 = vmatpush.msra.mxu2 %v128_v33  ;;  %v126_v35 = vld [vmem:[%s365_s5 + $0x68] sm:$0xff] }
   0xd   :  { %95 = vmatpush.msra.mxu1 %v80_v13  ;;  %v125_v36 = vld [vmem:[%s365_s5 + $0x60] sm:$0xff]  ;;  %v124_v37 = vld [vmem:[%s365_s5 + $0x58] sm:$0xff]  ;;  %v123_v38 = vld [vmem:[%s365_s5 + $0x50] sm:$0xff] }
   0xe   :  { %53 = vmatpush.msra.mxu0 %v36_v10  ;;  %134 = vmatpush.msra.mxu2 %v127_v34  ;;  %v122_v39 = vld [vmem:[%s365_s5 + $0x48] sm:$0xff]  ;;  %v121_v40 = vld [vmem:[%s365_s5 + $0x40] sm:$0xff]  ;;  %v120_v41 = vld [vmem:[%s365_s5 + $0x38] sm:$0xff] }
   0xf   :  { %96 = vmatpush.msra.mxu1 %v79_v15  ;;  %v119_v42 = vld [vmem:[%s365_s5 + $0x30] sm:$0xff]  ;;  %v118_v43 = vld [vmem:[%s365_s5 + $0x28] sm:$0xff]  ;;  %v117_v44 = vld [vmem:[%s365_s5 + $0x20] sm:$0xff] }
  0x10   :  { %54 = vmatpush.msra.mxu0 %v35_v12  ;;  %135 = vmatpush.msra.mxu2 %v126_v35  ;;  %v116_v45 = vld [vmem:[%s365_s5 + $0x18] sm:$0xff]  ;;  %v158_v46 = vld [vmem:[%s362_s2] ss:$0 sm:$0xff]  ;;  %v115_v51 = vld [vmem:[%s365_s5 + $0x10] sm:$0xff] }
  0x11   :  { %97 = vmatpush.msra.mxu1 %v78_v17  ;;  %v114_v52 = vld [vmem:[%s365_s5 + $0x8] sm:$0xff]  ;;  %v113_v53 = vld [vmem:[%s365_s5] sm:$0xff] }
  0x12   :  { %55 = vmatpush.msra.mxu0 %v34_v14  ;;  %136 = vmatpush.msra.mxu2 %v125_v36  ;;  %v159_v54 = vld [vmem:[%s364_s4] ss:$0 sm:$0xff] }
  0x13   :  { %98 = vmatpush.msra.mxu1 %v77_v19  ;;  %v160_v59 = vld [vmem:[%s366_s6] ss:$0 sm:$0xff] }
  0x14   :  { %56 = vmatpush.msra.mxu0 %v33_v16  ;;  %137 = vmatpush.msra.mxu2 %v124_v37 }
  0x15   :  { %99 = vmatpush.msra.mxu1 %v76_v21 }
  0x16   :  { %57 = vmatpush.msra.mxu0 %v32_v18  ;;  %138 = vmatpush.msra.mxu2 %v123_v38 }
  0x17   :  { %100 = vmatpush.msra.mxu1 %v75_v23 }
  0x18   :  { %58 = vmatpush.msra.mxu0 %v31_v20  ;;  %139 = vmatpush.msra.mxu2 %v122_v39 }
  0x19   :  { %101 = vmatpush.msra.mxu1 %v74_v25 }
  0x1a   :  { %59 = vmatpush.msra.mxu0 %v30_v22  ;;  %140 = vmatpush.msra.mxu2 %v121_v40 }
  0x1b   :  { %102 = vmatpush.msra.mxu1 %v73_v27 }
  0x1c   :  { %60 = vmatpush.msra.mxu0 %v29_v24  ;;  %141 = vmatpush.msra.mxu2 %v120_v41 }
  0x1d   :  { %103 = vmatpush.msra.mxu1 %v72_v30 }
  0x1e   :  { %61 = vmatpush.msra.mxu0 %v28_v26  ;;  %142 = vmatpush.msra.mxu2 %v119_v42 }
  0x1f   :  { %104 = vmatpush.msra.mxu1 %v71_v31 }
  0x20   :  { %62 = vmatpush.msra.mxu0 %v27_v28  ;;  %143 = vmatpush.msra.mxu2 %v118_v43 }
  0x21   :  { %63 = vmatmul.f32.vlgmr.msra.gmra.mxu0 %v26_v29  ;;  %105 = vmatpush.msra.mxu1 %v70_v32 }
  0x22   :  { %144 = vmatpush.msra.mxu2 %v117_v44 }
  0x24   :  { %145 = vmatpush.msra.mxu2 %v116_v45 }
  0x26   :  { %146 = vmatpush.msra.mxu2 %v115_v51 }
  0x28   :  { %147 = vmatpush.msra.mxu2 %v114_v52 }
  0x2a   :  { %148 = vmatpush.msra.mxu2 %v113_v53 }
  0x9e   :  { %v64_v47 = vpop.f32.mrf.mxu0 }
  0x9f   :  { %v65_v48 = vadd.f32 %v158_v46, %v64_v47 }
  0xa1   :  { %vm67_vm0 = vcmp.gt.f32.partialorder %v65_v48, 0.0  ;;  %v68_v49 = vmul.f32 0.01, %v65_v48 }
  0xa3   :  { %v69_v50 = vsel %vm67_vm0, %v65_v48, %v68_v49 }
  0xa4   :  { %106 = vmatmul.f32.vlgmr.msra.gmra.mxu1 %v69_v50 }
 0x121   :  { %v107_v55 = vpop.f32.mrf.mxu1 }
 0x122   :  { %v108_v56 = vadd.f32 %v159_v54, %v107_v55 }
 0x124   :  { %vm110_vm1 = vcmp.gt.f32.partialorder %v108_v56, 0.0  ;;  %v111_v57 = vmul.f32 0.01, %v108_v56 }
 0x126   :  { %v112_v58 = vsel %vm110_vm1, %v108_v56, %v111_v57 }
 0x127   :  { %149 = vmatmul.f32.vlgmr.msra.gmra.mxu2 %v112_v58 }
 0x1aa   :  { %v150_v60 = vpop.f32.mrf.mxu2 }
 0x1ab   :  { %v151_v61 = vadd.f32 %v160_v59, %v150_v60 }
 0x1ad   :  { %153 = vst [vmem:[%s367_s7] sm:$0xff] %v151_v61 }

</bundles_post_ra>
